<compile_context>
chip_gen: v7x
topology: tpu7x:2x2x1
jax: 0.10.0
libtpu: 0.0.40
codegen_flags: <defaults>
</compile_context>

<pallas_src>
import functools

import jax
import jax.numpy as jnp
from jax import lax
from jax.experimental import pallas as pl
from jax.experimental.pallas import tpu as pltpu

EPS = 1e-5            # BatchNorm2d eps
LANE = 128            # lane width / MXU column padding target
ROW_ALIGN = 16        # sublane alignment (bf16 tiles are (16, 128))
MAX_TM_MATMUL = 1024  # upper bound for matmul row tile
MAX_TM_APPLY = 2048   # row tile for the pure-streaming BN/ReLU passes


def _round_up(x, m):
    return (x + m - 1) // m * m


def _vmem_limit_bytes():
    """Per-chip VMEM budget: ~55% of physical (≈35 MiB on v7x, ≈70 MiB on v5e/v6e)."""
    try:
        cap = int(pltpu.get_tpu_info().vmem_capacity_bytes)
    except Exception:
        cap = 64 * 1024 * 1024          # conservative (v7x-sized) fallback
    return min(int(cap * 0.55), 96 * 1024 * 1024)


VMEM_LIMIT = _vmem_limit_bytes()


# ----------------------------- Pallas kernels ------------------------------ #

def _matmul_stats_kernel(p_ref, w_ref, y_ref, stats_ref):
    """(TM, K) @ (K, Cout) on the MXU + per-block per-channel sum / sum-of-squares.

    Stats are taken from the f32 accumulator BEFORE the bf16 downcast of y, and
    are emitted per grid block (no carried accumulator), so the M grid axis is
    "parallel" and can shard across v7x's two TensorCores.
    """
    y = jnp.dot(p_ref[...], w_ref[...], preferred_element_type=jnp.float32)
    y_ref[...] = y.astype(y_ref.dtype)
    s = jnp.sum(y, axis=0, keepdims=True)            # (1, Cout_pad)
    ss = jnp.sum(y * y, axis=0, keepdims=True)       # (1, Cout_pad)
    stats_ref[...] = jnp.concatenate([s, ss], axis=0)


def _bn_apply_kernel(y_ref, scale_ref, shift_ref, o_ref, *, apply_relu):
    """Folded BN: y*scale + shift (+ ReLU). bf16 in, f32 math, bf16 out."""
    out = y_ref[...].astype(jnp.float32) * scale_ref[...] + shift_ref[...]
    if apply_relu:
        out = jnp.maximum(out, 0.0)
    o_ref[...] = out.astype(o_ref.dtype)


def _bn_apply_residual_kernel(y_ref, scale_ref, shift_ref,
                              r_ref, rscale_ref, rshift_ref, o_ref):
    """Folded BN on left branch + folded BN (or identity) on right + add + ReLU."""
    left = y_ref[...].astype(jnp.float32) * scale_ref[...] + shift_ref[...]
    right = r_ref[...].astype(jnp.float32) * rscale_ref[...] + rshift_ref[...]
    o_ref[...] = jnp.maximum(left + right, 0.0).astype(o_ref.dtype)


# --------------------------- pallas_call wrappers --------------------------- #

def conv_matmul_stats(patches_bf16, w2d_bf16, *, tm):
    """patches (M_pad, K_pad) bf16 @ w (K_pad, Cout_pad) bf16 -> y bf16 + (sum, sumsq) f32."""
    m_pad, k_pad = patches_bf16.shape
    cout_pad = w2d_bf16.shape[1]
    grid_m = m_pad // tm
    y, stats = pl.pallas_call(
        _matmul_stats_kernel,
        out_shape=(jax.ShapeDtypeStruct((m_pad, cout_pad), jnp.bfloat16),
                   jax.ShapeDtypeStruct((grid_m, 2, cout_pad), jnp.float32)),
        grid=(grid_m,),
        in_specs=[pl.BlockSpec((tm, k_pad), lambda i: (i, 0)),
                  pl.BlockSpec((k_pad, cout_pad), lambda i: (0, 0))],
        out_specs=(pl.BlockSpec((tm, cout_pad), lambda i: (i, 0)),
                   pl.BlockSpec((None, 2, cout_pad), lambda i: (i, 0, 0))),
        compiler_params=pltpu.CompilerParams(
            dimension_semantics=("parallel",),
            vmem_limit_bytes=VMEM_LIMIT),
    )(patches_bf16, w2d_bf16)
    return y, jnp.sum(stats, axis=0)                  # (2, Cout_pad)


def bn_apply(y, scale, shift, *, apply_relu, tm):
    m_pad, cout_pad = y.shape
    grid = (m_pad // tm,)
    tile = pl.BlockSpec((tm, cout_pad), lambda i: (i, 0))
    vec = pl.BlockSpec((1, cout_pad), lambda i: (0, 0))
    kernel = functools.partial(_bn_apply_kernel, apply_relu=apply_relu)
    return pl.pallas_call(
        kernel,
        out_shape=jax.ShapeDtypeStruct((m_pad, cout_pad), jnp.bfloat16),
        grid=grid,
        in_specs=[tile, vec, vec],
        out_specs=tile,
        compiler_params=pltpu.CompilerParams(
            dimension_semantics=("parallel",),
            vmem_limit_bytes=VMEM_LIMIT),
    )(y, scale, shift)


def bn_apply_residual(y, scale, shift, r, rscale, rshift, *, tm):
    m_pad, cout_pad = y.shape
    grid = (m_pad // tm,)
    tile = pl.BlockSpec((tm, cout_pad), lambda i: (i, 0))
    vec = pl.BlockSpec((1, cout_pad), lambda i: (0, 0))
    return pl.pallas_call(
        _bn_apply_residual_kernel,
        out_shape=jax.ShapeDtypeStruct((m_pad, cout_pad), jnp.bfloat16),
        grid=grid,
        in_specs=[tile, vec, vec, tile, vec, vec],
        out_specs=tile,
        compiler_params=pltpu.CompilerParams(
            dimension_semantics=("parallel",),
            vmem_limit_bytes=VMEM_LIMIT),
    )(y, scale, shift, r, rscale, rshift)


# ------------------------------ JAX glue ----------------------------------- #

def _conv_out_hw(h, w, k, stride, pad):
    return (h + 2 * pad - k) // stride + 1, (w + 2 * pad - k) // stride + 1


def extract_patches_padded(x_nhwc, k, stride, pad, m_pad, k_pad):
    """bf16 im2col built directly at the padded (m_pad, k_pad) layout.

    Column order is (dy, dx, c); zero columns/rows are appended in the same
    concatenates so no separate full-tensor pad copy is required.
    """
    n, h, w, c = x_nhwc.shape
    ho, wo = _conv_out_hw(h, w, k, stride, pad)
    xp = jnp.pad(x_nhwc, ((0, 0), (pad, pad), (pad, pad), (0, 0)))
    cols = []
    for dy in range(k):
        for dx in range(k):
            cols.append(xp[:, dy:dy + stride * (ho - 1) + 1:stride,
                              dx:dx + stride * (wo - 1) + 1:stride, :])
    kk = k * k * c
    if k_pad > kk:
        cols.append(jnp.zeros((n, ho, wo, k_pad - kk), x_nhwc.dtype))
    patches = jnp.concatenate(cols, axis=-1).reshape(n * ho * wo, k_pad)
    m = n * ho * wo
    if m_pad > m:
        patches = jnp.concatenate(
            [patches, jnp.zeros((m_pad - m, k_pad), x_nhwc.dtype)], axis=0)
    return patches


def _w2d_padded(w_oihw, k_pad, cout_pad):
    """torch Conv2d weight (Cout, Cin, kh, kw) -> padded bf16 (k_pad, cout_pad)."""
    c_out, c_in, kh, kw = w_oihw.shape
    w2d = jnp.transpose(w_oihw, (2, 3, 1, 0)).reshape(kh * kw * c_in, c_out)
    return jnp.pad(w2d, ((0, k_pad - kh * kw * c_in),
                         (0, cout_pad - c_out))).astype(jnp.bfloat16)


def _fold_bn(stats, m_real, gamma, beta, cout_pad):
    """sum/sumsq -> per-channel (scale, shift) implementing train-mode BN (unbiased=False)."""
    c_out = gamma.shape[0]
    s, ss = stats[0], stats[1]
    mean = s / float(m_real)
    # Clamp: E[y^2] - E[y]^2 can go slightly negative in f32 (catastrophic cancel).
    var = jnp.maximum(ss / float(m_real) - mean * mean, 0.0)
    gamma_p = jnp.zeros((cout_pad,), jnp.float32).at[:c_out].set(gamma)
    beta_p = jnp.zeros((cout_pad,), jnp.float32).at[:c_out].set(beta)
    scale = gamma_p * lax.rsqrt(var + EPS)            # padded channels: gamma=0 -> scale=0
    shift = beta_p - mean * scale
    return scale.reshape(1, cout_pad), shift.reshape(1, cout_pad)


def _choose_tm_matmul(m, k_pad, cout_pad, vmem_limit):
    """Largest power-of-two row tile whose double-buffered bf16 working set fits."""
    budget = int(vmem_limit * 0.7)
    tm = MAX_TM_MATMUL
    while tm > ROW_ALIGN:
        ws = 2 * 2 * (tm * k_pad + k_pad * cout_pad + tm * cout_pad) \
             + 2 * 4 * 2 * cout_pad
        if ws <= budget:
            break
        tm //= 2
    tm = min(tm, _round_up(m, ROW_ALIGN))
    return max(tm, ROW_ALIGN)


def _choose_tm_apply(m_pad, tm):
    """Largest multiple of tm that divides m_pad and is <= MAX_TM_APPLY."""
    steps = m_pad // tm
    for d in range(steps, 0, -1):
        if steps % d == 0 and tm * d <= MAX_TM_APPLY:
            return tm * d
    return tm


def init_residual_block(key, in_feats, out_feats, first_stride):
    keys = jax.random.split(key, 7)
    p = {
        "w1": 0.1 * jax.random.normal(keys[0], (out_feats, in_feats, 3, 3), jnp.float32),
        "g1": 1.0 + 0.1 * jax.random.normal(keys[1], (out_feats,), jnp.float32),
        "b1": 0.1 * jax.random.normal(keys[2], (out_feats,), jnp.float32),
        "w2": 0.1 * jax.random.normal(keys[3], (out_feats, out_feats, 3, 3), jnp.float32),
        "g2": 1.0 + 0.1 * jax.random.normal(keys[4], (out_feats,), jnp.float32),
        "b2": 0.1 * jax.random.normal(keys[5], (out_feats,), jnp.float32),
    }
    if first_stride > 1:
        p["wr"] = 0.1 * jax.random.normal(keys[6], (out_feats, in_feats, 1, 1), jnp.float32)
        p["gr"] = jnp.ones((out_feats,), jnp.float32)   # BatchNorm2d default init
        p["br"] = jnp.zeros((out_feats,), jnp.float32)
    return p


def residual_block_forward(x_nhwc, p, first_stride):
    """x_nhwc: (N, H, W, Cin) bf16 -> (N, Ho, Wo, Cout) bf16."""
    n, h, w, c_in = x_nhwc.shape
    c_out = p["w1"].shape[0]
    cout_pad = _round_up(c_out, LANE)

    ho, wo = _conv_out_hw(h, w, 3, first_stride, 1)
    m = n * ho * wo
    k1_pad = _round_up(9 * c_in, LANE)
    k2_pad = _round_up(9 * c_out, LANE)
    tm = _choose_tm_matmul(m, max(k1_pad, k2_pad), cout_pad, VMEM_LIMIT)
    m_pad = _round_up(m, tm)
    tm_apply = _choose_tm_apply(m_pad, tm)

    # ---- conv1 (3x3, stride): bf16 im2col -> MXU matmul + partial BN stats ----
    p1 = extract_patches_padded(x_nhwc, 3, first_stride, 1, m_pad, k1_pad)
    w1 = _w2d_padded(p["w1"], k1_pad, cout_pad)
    y1, st1 = conv_matmul_stats(p1, w1, tm=tm)
    sc1, sh1 = _fold_bn(st1, m, p["g1"], p["b1"], cout_pad)
    h1 = bn_apply(y1, sc1, sh1, apply_relu=True, tm=tm_apply)   # (m_pad, cout_pad) bf16

    # ---- right branch: 1x1 projection + BN (folded later) or identity ----
    if first_stride > 1:
        # Reuse conv1's centre-tap (dy=1, dx=1) columns: identical to a fresh
        # stride-`first_stride` 1x1 im2col of x, no second patch materialization.
        kr_pad = _round_up(c_in, 8)
        pr = p1[:, 4 * c_in:5 * c_in]
        if kr_pad > c_in:
            pr = jnp.pad(pr, ((0, 0), (0, kr_pad - c_in)))
        wr = _w2d_padded(p["wr"], kr_pad, cout_pad)
        yr, str_ = conv_matmul_stats(pr, wr, tm=tm)
        rsc, rsh = _fold_bn(str_, m, p["gr"], p["br"], cout_pad)
    else:
        # identity shortcut (torch spec only projects when first_stride > 1)
        assert c_in == c_out, "identity shortcut needs in_feats == out_feats"
        yr = jnp.pad(x_nhwc.reshape(m, c_in),
                     ((0, m_pad - m), (0, cout_pad - c_in)))
        rsc = jnp.ones((1, cout_pad), jnp.float32)
        rsh = jnp.zeros((1, cout_pad), jnp.float32)

    # ---- conv2 (3x3, stride 1): matmul + stats, fused BN2 + right-BN + add + ReLU ----
    h1_img = h1[:m, :c_out].reshape(n, ho, wo, c_out)           # already bf16
    p2 = extract_patches_padded(h1_img, 3, 1, 1, m_pad, k2_pad)
    w2 = _w2d_padded(p["w2"], k2_pad, cout_pad)
    y2, st2 = conv_matmul_stats(p2, w2, tm=tm)
    sc2, sh2 = _fold_bn(st2, m, p["g2"], p["b2"], cout_pad)
    out = bn_apply_residual(y2, sc2, sh2, yr, rsc, rsh, tm=tm_apply)
    return out[:m, :c_out].reshape(n, ho, wo, c_out)


class BlockGroupPallas:
    """n_blocks ResidualBlocks; only the first uses first_stride."""

    def __init__(self, key, n_blocks, in_feats, out_feats, first_stride=1):
        keys = jax.random.split(key, n_blocks)
        self.blocks = [(init_residual_block(keys[0], in_feats, out_feats, first_stride),
                        first_stride)]
        for i in range(1, n_blocks):
            self.blocks.append((init_residual_block(keys[i], out_feats, out_feats, 1), 1))

    def __call__(self, x_nchw):
        # NCHW -> NHWC, bf16 once at the boundary (inter-block tensors stay bf16).
        x = jnp.transpose(x_nchw, (0, 2, 3, 1)).astype(jnp.bfloat16)
        for params, stride in self.blocks:
            x = residual_block_forward(x, params, stride)
        return jnp.transpose(x, (0, 3, 1, 2)).astype(jnp.float32)   # NHWC -> NCHW f32


if __name__ == "__main__":
    key = jax.random.PRNGKey(0)
    k_x, k_params = jax.random.split(key)

    batch, in_feats, out_feats, spatial = 2, 4, 8, 16
    n_blocks, first_stride = 2, 2

    x = jax.random.normal(k_x, (batch, in_feats, spatial, spatial), jnp.float32)
    model = BlockGroupPallas(k_params, n_blocks=n_blocks, in_feats=in_feats,
                             out_feats=out_feats, first_stride=first_stride)

    forward = jax.jit(model.__call__)
    y = forward(x)
    y = jax.block_until_ready(y)
    assert y.shape == (batch, out_feats, spatial // first_stride, spatial // first_stride), y.shape
    assert bool(jnp.all(jnp.isfinite(y)))
    print("KERNEL_OK")
</pallas_src>

<mosaic_0001>
module attributes {stable_mosaic.version = 11 : i64} {
  func.func @_bn_apply_kernel(%arg0: i32, %arg1: memref<128x128xbf16, #tpu.memory_space<vmem>>, %arg2: memref<1x128xf32, #tpu.memory_space<vmem>>, %arg3: memref<1x128xf32, #tpu.memory_space<vmem>>, %arg4: memref<128x128xbf16, #tpu.memory_space<vmem>>) attributes {dimension_semantics = [#tpu.dimension_semantics<parallel>], iteration_bounds = array<i64: 1>, scalar_prefetch = 0 : i64, scratch_operands = 0 : i64, tpu.core_type = #tpu.core_type<tc>, window_params = [{transform_indices = @transform_0, window_bounds = array<i64: 128, 128>}, {pipeline_mode = #tpu.pipeline_mode<synchronous>, transform_indices = @transform_1, window_bounds = array<i64: 1, 128>}, {pipeline_mode = #tpu.pipeline_mode<synchronous>, transform_indices = @transform_2, window_bounds = array<i64: 1, 128>}, {transform_indices = @transform_3, window_bounds = array<i64: 128, 128>}]} {
    %c0 = arith.constant 0 : index
    %c0_0 = arith.constant 0 : index
    %0 = vector.load %arg1[%c0, %c0_0] : memref<128x128xbf16, #tpu.memory_space<vmem>>, vector<128x128xbf16>
    %1 = arith.extf %0 : vector<128x128xbf16> to vector<128x128xf32>
    %c0_1 = arith.constant 0 : index
    %c0_2 = arith.constant 0 : index
    %2 = vector.load %arg2[%c0_1, %c0_2] : memref<1x128xf32, #tpu.memory_space<vmem>>, vector<1x128xf32>
    %3 = vector.broadcast %2 : vector<1x128xf32> to vector<128x128xf32>
    %4 = arith.mulf %1, %3 : vector<128x128xf32>
    %c0_3 = arith.constant 0 : index
    %c0_4 = arith.constant 0 : index
    %5 = vector.load %arg3[%c0_3, %c0_4] : memref<1x128xf32, #tpu.memory_space<vmem>>, vector<1x128xf32>
    %6 = vector.broadcast %5 : vector<1x128xf32> to vector<128x128xf32>
    %7 = arith.addf %4, %6 : vector<128x128xf32>
    %cst = arith.constant 0.000000e+00 : f32
    %8 = vector.broadcast %cst : f32 to vector<128x128xf32>
    %9 = arith.maximumf %7, %8 : vector<128x128xf32>
    %10 = arith.truncf %9 : vector<128x128xf32> to vector<128x128xbf16>
    %c0_5 = arith.constant 0 : index
    %c0_6 = arith.constant 0 : index
    %11 = vector.load %arg4[%c0_5, %c0_6] : memref<128x128xbf16, #tpu.memory_space<vmem>>, vector<128x128xbf16>
    tpu.vector_store %arg4[%c0_5, %c0_6], %10 {strides = array<i32>} : memref<128x128xbf16, #tpu.memory_space<vmem>>, vector<128x128xbf16>,
    return
  }
  func.func @transform_0(%arg0: i32) -> (i32, i32) {
    %c0_i32 = arith.constant 0 : i32
    %c0_i32_0 = arith.constant 0 : i32
    return %arg0, %c0_i32 : i32, i32
  }
  func.func @transform_1(%arg0: i32) -> (i32, i32) {
    %c0_i32 = arith.constant 0 : i32
    %c0_i32_0 = arith.constant 0 : i32
    %c0_i32_1 = arith.constant 0 : i32
    return %c0_i32, %c0_i32_0 : i32, i32
  }
  func.func @transform_2(%arg0: i32) -> (i32, i32) {
    %c0_i32 = arith.constant 0 : i32
    %c0_i32_0 = arith.constant 0 : i32
    %c0_i32_1 = arith.constant 0 : i32
    return %c0_i32, %c0_i32_0 : i32, i32
  }
  func.func @transform_3(%arg0: i32) -> (i32, i32) {
    %c0_i32 = arith.constant 0 : i32
    %c0_i32_0 = arith.constant 0 : i32
    return %arg0, %c0_i32 : i32, i32
  }
}

module attributes {stable_mosaic.version = 11 : i64} {
  func.func @_matmul_stats_kernel(%arg0: i32, %arg1: memref<128x128xbf16, #tpu.memory_space<vmem>>, %arg2: memref<128x128xbf16, #tpu.memory_space<vmem>>, %arg3: memref<128x128xbf16, #tpu.memory_space<vmem>>, %arg4: memref<1x2x128xf32, #tpu.memory_space<vmem>>) attributes {dimension_semantics = [#tpu.dimension_semantics<parallel>], iteration_bounds = array<i64: 1>, scalar_prefetch = 0 : i64, scratch_operands = 0 : i64, tpu.core_type = #tpu.core_type<tc>, window_params = [{transform_indices = @transform_0, window_bounds = array<i64: 128, 128>}, {pipeline_mode = #tpu.pipeline_mode<synchronous>, transform_indices = @transform_1, window_bounds = array<i64: 128, 128>}, {transform_indices = @transform_2, window_bounds = array<i64: 128, 128>}, {transform_indices = @transform_3, window_bounds = array<i64: 1, 2, 128>}]} {
    %c0 = arith.constant 0 : index
    %c0_0 = arith.constant 0 : index
    %0 = vector.load %arg1[%c0, %c0_0] : memref<128x128xbf16, #tpu.memory_space<vmem>>, vector<128x128xbf16>
    %c0_1 = arith.constant 0 : index
    %c0_2 = arith.constant 0 : index
    %1 = vector.load %arg2[%c0_1, %c0_2] : memref<128x128xbf16, #tpu.memory_space<vmem>>, vector<128x128xbf16>
    %cst = arith.constant dense<0.000000e+00> : vector<128x128xf32>
    %2 = tpu.matmul %0, %1, %cst {dimension_numbers = #tpu.dot_dimension_numbers<[1], [0], [0], [1], [0, 0, 1, 1], [], []>} : vector<128x128xbf16>, vector<128x128xbf16>, vector<128x128xf32> -> vector<128x128xf32>
    %3 = arith.truncf %2 : vector<128x128xf32> to vector<128x128xbf16>
    %c0_3 = arith.constant 0 : index
    %c0_4 = arith.constant 0 : index
    %4 = vector.load %arg3[%c0_3, %c0_4] : memref<128x128xbf16, #tpu.memory_space<vmem>>, vector<128x128xbf16>
    tpu.vector_store %arg3[%c0_3, %c0_4], %3 {strides = array<i32>} : memref<128x128xbf16, #tpu.memory_space<vmem>>, vector<128x128xbf16>,
    %cst_5 = arith.constant dense<0.000000e+00> : vector<128xf32>
    %5 = vector.multi_reduction <add>, %2, %cst_5 [0] : vector<128x128xf32> to vector<128xf32>
    %6 = vector.shape_cast %5 : vector<128xf32> to vector<1x128xf32>
    %7 = arith.mulf %2, %2 : vector<128x128xf32>
    %cst_6 = arith.constant dense<0.000000e+00> : vector<128xf32>
    %8 = vector.multi_reduction <add>, %7, %cst_6 [0] : vector<128x128xf32> to vector<128xf32>
    %9 = vector.shape_cast %8 : vector<128xf32> to vector<1x128xf32>
    %10 = tpu.concatenate %6, %9 in 0 : vector<1x128xf32>, vector<1x128xf32> -> vector<2x128xf32>
    %c0_7 = arith.constant 0 : index
    %c0_8 = arith.constant 0 : index
    %c0_9 = arith.constant 0 : index
    %11 = vector.load %arg4[%c0_7, %c0_8, %c0_9] : memref<1x2x128xf32, #tpu.memory_space<vmem>>, vector<1x2x128xf32>
    %12 = vector.shape_cast %11 : vector<1x2x128xf32> to vector<2x128xf32>
    %13 = vector.shape_cast %10 : vector<2x128xf32> to vector<1x2x128xf32>
    tpu.vector_store %arg4[%c0_7, %c0_8, %c0_9], %13 {strides = array<i32>} : memref<1x2x128xf32, #tpu.memory_space<vmem>>, vector<1x2x128xf32>,
    return
  }
  func.func @transform_0(%arg0: i32) -> (i32, i32) {
    %c0_i32 = arith.constant 0 : i32
    %c0_i32_0 = arith.constant 0 : i32
    return %arg0, %c0_i32 : i32, i32
  }
  func.func @transform_1(%arg0: i32) -> (i32, i32) {
    %c0_i32 = arith.constant 0 : i32
    %c0_i32_0 = arith.constant 0 : i32
    %c0_i32_1 = arith.constant 0 : i32
    return %c0_i32, %c0_i32_0 : i32, i32
  }
  func.func @transform_2(%arg0: i32) -> (i32, i32) {
    %c0_i32 = arith.constant 0 : i32
    %c0_i32_0 = arith.constant 0 : i32
    return %arg0, %c0_i32 : i32, i32
  }
  func.func @transform_3(%arg0: i32) -> (i32, i32, i32) {
    %c0_i32 = arith.constant 0 : i32
    %c0_i32_0 = arith.constant 0 : i32
    %c0_i32_1 = arith.constant 0 : i32
    return %arg0, %c0_i32, %c0_i32_0 : i32, i32, i32
  }
}

module attributes {stable_mosaic.version = 11 : i64} {
  func.func @_matmul_stats_kernel(%arg0: i32, %arg1: memref<128x8xbf16, #tpu.memory_space<vmem>>, %arg2: memref<8x128xbf16, #tpu.memory_space<vmem>>, %arg3: memref<128x128xbf16, #tpu.memory_space<vmem>>, %arg4: memref<1x2x128xf32, #tpu.memory_space<vmem>>) attributes {dimension_semantics = [#tpu.dimension_semantics<parallel>], iteration_bounds = array<i64: 1>, scalar_prefetch = 0 : i64, scratch_operands = 0 : i64, tpu.core_type = #tpu.core_type<tc>, window_params = [{transform_indices = @transform_0, window_bounds = array<i64: 128, 8>}, {pipeline_mode = #tpu.pipeline_mode<synchronous>, transform_indices = @transform_1, window_bounds = array<i64: 8, 128>}, {transform_indices = @transform_2, window_bounds = array<i64: 128, 128>}, {transform_indices = @transform_3, window_bounds = array<i64: 1, 2, 128>}]} {
    %c0 = arith.constant 0 : index
    %c0_0 = arith.constant 0 : index
    %0 = vector.load %arg1[%c0, %c0_0] : memref<128x8xbf16, #tpu.memory_space<vmem>>, vector<128x8xbf16>
    %c0_1 = arith.constant 0 : index
    %c0_2 = arith.constant 0 : index
    %1 = vector.load %arg2[%c0_1, %c0_2] : memref<8x128xbf16, #tpu.memory_space<vmem>>, vector<8x128xbf16>
    %cst = arith.constant dense<0.000000e+00> : vector<128x128xf32>
    %2 = tpu.matmul %0, %1, %cst {dimension_numbers = #tpu.dot_dimension_numbers<[1], [0], [0], [1], [0, 0, 1, 1], [], []>} : vector<128x8xbf16>, vector<8x128xbf16>, vector<128x128xf32> -> vector<128x128xf32>
    %3 = arith.truncf %2 : vector<128x128xf32> to vector<128x128xbf16>
    %c0_3 = arith.constant 0 : index
    %c0_4 = arith.constant 0 : index
    %4 = vector.load %arg3[%c0_3, %c0_4] : memref<128x128xbf16, #tpu.memory_space<vmem>>, vector<128x128xbf16>
    tpu.vector_store %arg3[%c0_3, %c0_4], %3 {strides = array<i32>} : memref<128x128xbf16, #tpu.memory_space<vmem>>, vector<128x128xbf16>,
    %cst_5 = arith.constant dense<0.000000e+00> : vector<128xf32>
    %5 = vector.multi_reduction <add>, %2, %cst_5 [0] : vector<128x128xf32> to vector<128xf32>
    %6 = vector.shape_cast %5 : vector<128xf32> to vector<1x128xf32>
    %7 = arith.mulf %2, %2 : vector<128x128xf32>
    %cst_6 = arith.constant dense<0.000000e+00> : vector<128xf32>
    %8 = vector.multi_reduction <add>, %7, %cst_6 [0] : vector<128x128xf32> to vector<128xf32>
    %9 = vector.shape_cast %8 : vector<128xf32> to vector<1x128xf32>
    %10 = tpu.concatenate %6, %9 in 0 : vector<1x128xf32>, vector<1x128xf32> -> vector<2x128xf32>
    %c0_7 = arith.constant 0 : index
    %c0_8 = arith.constant 0 : index
    %c0_9 = arith.constant 0 : index
    %11 = vector.load %arg4[%c0_7, %c0_8, %c0_9] : memref<1x2x128xf32, #tpu.memory_space<vmem>>, vector<1x2x128xf32>
    %12 = vector.shape_cast %11 : vector<1x2x128xf32> to vector<2x128xf32>
    %13 = vector.shape_cast %10 : vector<2x128xf32> to vector<1x2x128xf32>
    tpu.vector_store %arg4[%c0_7, %c0_8, %c0_9], %13 {strides = array<i32>} : memref<1x2x128xf32, #tpu.memory_space<vmem>>, vector<1x2x128xf32>,
    return
  }
  func.func @transform_0(%arg0: i32) -> (i32, i32) {
    %c0_i32 = arith.constant 0 : i32
    %c0_i32_0 = arith.constant 0 : i32
    return %arg0, %c0_i32 : i32, i32
  }
  func.func @transform_1(%arg0: i32) -> (i32, i32) {
    %c0_i32 = arith.constant 0 : i32
    %c0_i32_0 = arith.constant 0 : i32
    %c0_i32_1 = arith.constant 0 : i32
    return %c0_i32, %c0_i32_0 : i32, i32
  }
  func.func @transform_2(%arg0: i32) -> (i32, i32) {
    %c0_i32 = arith.constant 0 : i32
    %c0_i32_0 = arith.constant 0 : i32
    return %arg0, %c0_i32 : i32, i32
  }
  func.func @transform_3(%arg0: i32) -> (i32, i32, i32) {
    %c0_i32 = arith.constant 0 : i32
    %c0_i32_0 = arith.constant 0 : i32
    %c0_i32_1 = arith.constant 0 : i32
    return %arg0, %c0_i32, %c0_i32_0 : i32, i32, i32
  }
}

module attributes {stable_mosaic.version = 11 : i64} {
  func.func @_bn_apply_residual_kernel(%arg0: i32, %arg1: memref<128x128xbf16, #tpu.memory_space<vmem>>, %arg2: memref<1x128xf32, #tpu.memory_space<vmem>>, %arg3: memref<1x128xf32, #tpu.memory_space<vmem>>, %arg4: memref<128x128xbf16, #tpu.memory_space<vmem>>, %arg5: memref<1x128xf32, #tpu.memory_space<vmem>>, %arg6: memref<1x128xf32, #tpu.memory_space<vmem>>, %arg7: memref<128x128xbf16, #tpu.memory_space<vmem>>) attributes {dimension_semantics = [#tpu.dimension_semantics<parallel>], iteration_bounds = array<i64: 1>, scalar_prefetch = 0 : i64, scratch_operands = 0 : i64, tpu.core_type = #tpu.core_type<tc>, window_params = [{transform_indices = @transform_0, window_bounds = array<i64: 128, 128>}, {pipeline_mode = #tpu.pipeline_mode<synchronous>, transform_indices = @transform_1, window_bounds = array<i64: 1, 128>}, {pipeline_mode = #tpu.pipeline_mode<synchronous>, transform_indices = @transform_2, window_bounds = array<i64: 1, 128>}, {transform_indices = @transform_3, window_bounds = array<i64: 128, 128>}, {pipeline_mode = #tpu.pipeline_mode<synchronous>, transform_indices = @transform_4, window_bounds = array<i64: 1, 128>}, {pipeline_mode = #tpu.pipeline_mode<synchronous>, transform_indices = @transform_5, window_bounds = array<i64: 1, 128>}, {transform_indices = @transform_6, window_bounds = array<i64: 128, 128>}]} {
    %c0 = arith.constant 0 : index
    %c0_0 = arith.constant 0 : index
    %0 = vector.load %arg1[%c0, %c0_0] : memref<128x128xbf16, #tpu.memory_space<vmem>>, vector<128x128xbf16>
    %1 = arith.extf %0 : vector<128x128xbf16> to vector<128x128xf32>
    %c0_1 = arith.constant 0 : index
    %c0_2 = arith.constant 0 : index
    %2 = vector.load %arg2[%c0_1, %c0_2] : memref<1x128xf32, #tpu.memory_space<vmem>>, vector<1x128xf32>
    %3 = vector.broadcast %2 : vector<1x128xf32> to vector<128x128xf32>
    %4 = arith.mulf %1, %3 : vector<128x128xf32>
    %c0_3 = arith.constant 0 : index
    %c0_4 = arith.constant 0 : index
    %5 = vector.load %arg3[%c0_3, %c0_4] : memref<1x128xf32, #tpu.memory_space<vmem>>, vector<1x128xf32>
    %6 = vector.broadcast %5 : vector<1x128xf32> to vector<128x128xf32>
    %7 = arith.addf %4, %6 : vector<128x128xf32>
    %c0_5 = arith.constant 0 : index
    %c0_6 = arith.constant 0 : index
    %8 = vector.load %arg4[%c0_5, %c0_6] : memref<128x128xbf16, #tpu.memory_space<vmem>>, vector<128x128xbf16>
    %9 = arith.extf %8 : vector<128x128xbf16> to vector<128x128xf32>
    %c0_7 = arith.constant 0 : index
    %c0_8 = arith.constant 0 : index
    %10 = vector.load %arg5[%c0_7, %c0_8] : memref<1x128xf32, #tpu.memory_space<vmem>>, vector<1x128xf32>
    %11 = vector.broadcast %10 : vector<1x128xf32> to vector<128x128xf32>
    %12 = arith.mulf %9, %11 : vector<128x128xf32>
    %c0_9 = arith.constant 0 : index
    %c0_10 = arith.constant 0 : index
    %13 = vector.load %arg6[%c0_9, %c0_10] : memref<1x128xf32, #tpu.memory_space<vmem>>, vector<1x128xf32>
    %14 = vector.broadcast %13 : vector<1x128xf32> to vector<128x128xf32>
    %15 = arith.addf %12, %14 : vector<128x128xf32>
    %16 = arith.addf %7, %15 : vector<128x128xf32>
    %cst = arith.constant 0.000000e+00 : f32
    %17 = vector.broadcast %cst : f32 to vector<128x128xf32>
    %18 = arith.maximumf %16, %17 : vector<128x128xf32>
    %19 = arith.truncf %18 : vector<128x128xf32> to vector<128x128xbf16>
    %c0_11 = arith.constant 0 : index
    %c0_12 = arith.constant 0 : index
    %20 = vector.load %arg7[%c0_11, %c0_12] : memref<128x128xbf16, #tpu.memory_space<vmem>>, vector<128x128xbf16>
    tpu.vector_store %arg7[%c0_11, %c0_12], %19 {strides = array<i32>} : memref<128x128xbf16, #tpu.memory_space<vmem>>, vector<128x128xbf16>,
    return
  }
  func.func @transform_0(%arg0: i32) -> (i32, i32) {
    %c0_i32 = arith.constant 0 : i32
    %c0_i32_0 = arith.constant 0 : i32
    return %arg0, %c0_i32 : i32, i32
  }
  func.func @transform_1(%arg0: i32) -> (i32, i32) {
    %c0_i32 = arith.constant 0 : i32
    %c0_i32_0 = arith.constant 0 : i32
    %c0_i32_1 = arith.constant 0 : i32
    return %c0_i32, %c0_i32_0 : i32, i32
  }
  func.func @transform_2(%arg0: i32) -> (i32, i32) {
    %c0_i32 = arith.constant 0 : i32
    %c0_i32_0 = arith.constant 0 : i32
    %c0_i32_1 = arith.constant 0 : i32
    return %c0_i32, %c0_i32_0 : i32, i32
  }
  func.func @transform_3(%arg0: i32) -> (i32, i32) {
    %c0_i32 = arith.constant 0 : i32
    %c0_i32_0 = arith.constant 0 : i32
    return %arg0, %c0_i32 : i32, i32
  }
  func.func @transform_4(%arg0: i32) -> (i32, i32) {
    %c0_i32 = arith.constant 0 : i32
    %c0_i32_0 = arith.constant 0 : i32
    %c0_i32_1 = arith.constant 0 : i32
    return %c0_i32, %c0_i32_0 : i32, i32
  }
  func.func @transform_5(%arg0: i32) -> (i32, i32) {
    %c0_i32 = arith.constant 0 : i32
    %c0_i32_0 = arith.constant 0 : i32
    %c0_i32_1 = arith.constant 0 : i32
    return %c0_i32, %c0_i32_0 : i32, i32
  }
  func.func @transform_6(%arg0: i32) -> (i32, i32) {
    %c0_i32 = arith.constant 0 : i32
    %c0_i32_0 = arith.constant 0 : i32
    return %arg0, %c0_i32 : i32, i32
  }
}

</mosaic_0001>

<bundles_post_ra>
// kernel: a_call__.10
= control target key start
LH: loop header
LB: loop body
LE: loop exit
PB: predicated region body
PF: predicated region fallthrough
CT: control target
= control target key end

     0   :  { %s422_s0 = inlined_call_operand.vmem [shape: bf16[128,128], index: 0, kind: input, shape index: {}]   ;;  %s423_s1 = inlined_call_operand.vmem [shape: f32[1,128], index: 1, kind: input, shape index: {}]   ;;  %s424_s2 = inlined_call_operand.vmem [shape: f32[1,128], index: 2, kind: input, shape index: {}]   ;;  %s425_s3 = inlined_call_operand.vmem [shape: bf16[128,128], index: 3, kind: output, shape index: {}]  }
   0x1   :  { %v227_v0 = vld [vmem:[%s422_s0] sm:$0xff]   ;;  %v298_v4 = vld [vmem:[%s422_s0 + $0x8] sm:$0xff]   ;;  %v299_v5 = vld [vmem:[%s422_s0 + $0x10] sm:$0xff]  }
   0x2   :  { %v338_v1 = vld [vmem:[%s423_s1] ss:$0 sm:$0xff]  ;;  %v228_v2 = vunpack.c.l.bf16 %v227_v0  ;;  %v229_v3 = vunpack.c.h.bf16 %v227_v0  ;;  %v300_v6 = vld [vmem:[%s422_s0 + $0x18] sm:$0xff]   ;;  %v232_v8 = vunpack.c.l.bf16 %v298_v4  ;;  %v233_v9 = vunpack.c.h.bf16 %v298_v4  ;;  %v302_v33 = vld [vmem:[%s422_s0 + $0x28] sm:$0xff]  }
   0x3   :  { %v352_v7 = vld [vmem:[%s424_s2] ss:$0 sm:$0xff]  ;;  %v236_v10 = vunpack.c.l.bf16 %v299_v5  ;;  %v237_v11 = vunpack.c.h.bf16 %v299_v5  ;;  %v240_v14 = vunpack.c.l.bf16 %v300_v6  ;;  %v241_v15 = vunpack.c.h.bf16 %v300_v6  ;;  %v303_v38 = vld [vmem:[%s422_s0 + $0x30] sm:$0xff]   ;;  %v304_v43 = vld [vmem:[%s422_s0 + $0x38] sm:$0xff]  }
   0x4   :  { %v53_v12 = vmul.f32 %v228_v2, %v338_v1  ;;  %v54_v13 = vmul.f32 %v229_v3, %v338_v1  ;;  %v55_v16 = vmul.f32 %v232_v8, %v338_v1  ;;  %v56_v17 = vmul.f32 %v233_v9, %v338_v1  ;;  %v301_v28 = vld [vmem:[%s422_s0 + $0x20] sm:$0xff]  }
   0x5   :  { %v57_v18 = vmul.f32 %v236_v10, %v338_v1  ;;  %v58_v19 = vmul.f32 %v237_v11, %v338_v1  ;;  %v59_v22 = vmul.f32 %v240_v14, %v338_v1  ;;  %v60_v23 = vmul.f32 %v241_v15, %v338_v1 }
   0x6   :  { %v76_v20 = vadd.f32 %v352_v7, %v53_v12  ;;  %v77_v21 = vadd.f32 %v352_v7, %v54_v13  ;;  %v78_v24 = vadd.f32 %v352_v7, %v55_v16  ;;  %v79_v25 = vadd.f32 %v352_v7, %v56_v17 }
   0x7   :  { %v80_v26 = vadd.f32 %v352_v7, %v57_v18  ;;  %v81_v27 = vadd.f32 %v352_v7, %v58_v19  ;;  %v82_v31 = vadd.f32 %v352_v7, %v59_v22  ;;  %v83_v32 = vadd.f32 %v352_v7, %v60_v23 }
   0x8   :  { %v92_v29 = vmax.f32 %v76_v20, 0.0  ;;  %v93_v30 = vmax.f32 %v77_v21, 0.0  ;;  %v94_v34 = vmax.f32 %v78_v24, 0.0  ;;  %v95_v35 = vmax.f32 %v79_v25, 0.0 }
   0x9   :  { %v96_v36 = vmax.f32 %v80_v26, 0.0  ;;  %v97_v37 = vmax.f32 %v81_v27, 0.0  ;;  %v98_v40 = vmax.f32 %v82_v31, 0.0  ;;  %v99_v41 = vmax.f32 %v83_v32, 0.0 }
   0xa   :  { %v261_v39 = vpack.c.bf16 %v93_v30, %v92_v29  ;;  %v244_v42 = vunpack.c.l.bf16 %v301_v28  ;;  %v266_v44 = vpack.c.bf16 %v95_v35, %v94_v34  ;;  %v245_v46 = vunpack.c.h.bf16 %v301_v28 }
   0xb   :  { %v271_v45 = vpack.c.bf16 %v97_v37, %v96_v36  ;;  %v248_v47 = vunpack.c.l.bf16 %v302_v33  ;;  %v276_v48 = vpack.c.bf16 %v99_v41, %v98_v40  ;;  %v249_v50 = vunpack.c.h.bf16 %v302_v33 }
   0xc   :  { %262 = vst [vmem:[%s425_s3] sm:$0xff] %v261_v39   ;;  %v61_v49 = vmul.f32 %v244_v42, %v338_v1  ;;  %v252_v51 = vunpack.c.l.bf16 %v303_v38  ;;  %305 = vst [vmem:[%s425_s3 + $0x8] sm:$0xff] %v266_v44   ;;  %v62_v52 = vmul.f32 %v245_v46, %v338_v1  ;;  %v253_v54 = vunpack.c.h.bf16 %v303_v38 }
   0xd   :  { %306 = vst [vmem:[%s425_s3 + $0x10] sm:$0xff] %v271_v45   ;;  %v63_v53 = vmul.f32 %v248_v47, %v338_v1  ;;  %v256_v55 = vunpack.c.l.bf16 %v304_v43  ;;  %307 = vst [vmem:[%s425_s3 + $0x18] sm:$0xff] %v276_v48   ;;  %v64_v57 = vmul.f32 %v249_v50, %v338_v1  ;;  %v257_v59 = vunpack.c.h.bf16 %v304_v43 }
   0xe   :  { %v84_v56 = vadd.f32 %v352_v7, %v61_v49  ;;  %v65_v58 = vmul.f32 %v252_v51, %v338_v1  ;;  %v85_v60 = vadd.f32 %v352_v7, %v62_v52  ;;  %v66_v62 = vmul.f32 %v253_v54, %v338_v1 }
   0xf   :  { %v86_v61 = vadd.f32 %v352_v7, %v63_v53  ;;  %v67_v63 = vmul.f32 %v256_v55, %v338_v1  ;;  %v87_v2 = vadd.f32 %v352_v7, %v64_v57  ;;  %v68_v4 = vmul.f32 %v257_v59, %v338_v1 }
  0x10   :  { %v100_v0 = vmax.f32 %v84_v56, 0.0  ;;  %v88_v3 = vadd.f32 %v352_v7, %v65_v58  ;;  %v101_v5 = vmax.f32 %v85_v60, 0.0  ;;  %v89_v8 = vadd.f32 %v352_v7, %v66_v62 }
  0x11   :  { %v102_v6 = vmax.f32 %v86_v61, 0.0  ;;  %v90_v9 = vadd.f32 %v352_v7, %v67_v63  ;;  %v103_v10 = vmax.f32 %v87_v2, 0.0  ;;  %v91_v12 = vadd.f32 %v352_v7, %v68_v4 }
  0x12   :  { %v104_v11 = vmax.f32 %v88_v3, 0.0  ;;  %v281_v13 = vpack.c.bf16 %v101_v5, %v100_v0  ;;  %v105_v14 = vmax.f32 %v89_v8, 0.0 }
  0x13   :  { %v106_v15 = vmax.f32 %v90_v9, 0.0  ;;  %v286_v16 = vpack.c.bf16 %v103_v10, %v102_v6  ;;  %v107_v17 = vmax.f32 %v91_v12, 0.0 }
  0x14   :  { %308 = vst [vmem:[%s425_s3 + $0x20] sm:$0xff] %v281_v13   ;;  %v291_v1 = vpack.c.bf16 %v105_v14, %v104_v11 }
  0x15   :  { %309 = vst [vmem:[%s425_s3 + $0x28] sm:$0xff] %v286_v16   ;;  %v296_v18 = vpack.c.bf16 %v107_v17, %v106_v15 }
  0x16   :  { %310 = vst [vmem:[%s425_s3 + $0x30] sm:$0xff] %v291_v1  }
  0x17   :  { %311 = vst [vmem:[%s425_s3 + $0x38] sm:$0xff] %v296_v18  }

// kernel: a_call__.9
= control target key start
LH: loop header
LB: loop body
LE: loop exit
PB: predicated region body
PF: predicated region fallthrough
CT: control target
= control target key end

     0   :  { %vm377_vm0 = vcmask 1040384   ;;  %s658_s1 = inlined_call_operand.vmem [shape: bf16[128,128], index: 1, kind: input, shape index: {}]   ;;  %s659_s0 = inlined_call_operand.vmem [shape: bf16[128,128], index: 0, kind: input, shape index: {}]   ;;  %s660_s2 = inlined_call_operand.vmem [shape: bf16[128,128], index: 2, kind: output, shape index: {0}]   ;;  %s661_s3 = inlined_call_operand.vmem [shape: f32[1,2,128], index: 3, kind: output, shape index: {1}]  }
   0x1   :  { %v547_v0 = vld [vmem:[%s658_s1] sm:$0xff]   ;;  %v548_v1 = vld [vmem:[%s658_s1 + $0x8] sm:$0xff]   ;;  %v549_v2 = vld [vmem:[%s658_s1 + $0x10] sm:$0xff]  }
   0x2   :  { %499 = vmatprep.subr.bf16.mxu0 %v547_v0  ;;  %531 = vmatprep.subr.bf16.mxu1 %v547_v0  ;;  %v550_v3 = vld [vmem:[%s658_s1 + $0x18] sm:$0xff]   ;;  %v555_v4 = vld [vmem:[%s659_s0] sm:$0xff]   ;;  %v552_v7 = vld [vmem:[%s658_s1 + $0x28] sm:$0xff]  }
   0x3   :  { %500 = vmatpush3.bf16.msra.mxu0 %v547_v0  ;;  %539 = vmatpush3.bf16.msra.mxu1 %v547_v0  ;;  %v551_v5 = vld [vmem:[%s658_s1 + $0x20] sm:$0xff]   ;;  %v553_v8 = vld [vmem:[%s658_s1 + $0x30] sm:$0xff]   ;;  %v554_v9 = vld [vmem:[%s658_s1 + $0x38] sm:$0xff]  }
   0x4   :  { %501 = vmatprep.subr.bf16.mxu0 %v548_v1  ;;  %532 = vmatprep.subr.bf16.mxu1 %v548_v1  ;;  %v559_v6 = vld [vmem:[%s659_s0 + $0x20] sm:$0xff]   ;;  %v556_v10 = vld [vmem:[%s659_s0 + $0x8] sm:$0xff]   ;;  %v557_v12 = vld [vmem:[%s659_s0 + $0x10] sm:$0xff]  }
   0x5   :  { %515 = vmatprep.mubr.bf16.mxu0 %v555_v4  ;;  %523 = vmatprep.mubr.bf16.mxu1 %v559_v6  ;;  %v560_v11 = vld [vmem:[%s659_s0 + $0x28] sm:$0xff]   ;;  %v561_v13 = vld [vmem:[%s659_s0 + $0x30] sm:$0xff]   ;;  %v558_v14 = vld [vmem:[%s659_s0 + $0x18] sm:$0xff]  }
   0x6   :  { %v562_v15 = vld [vmem:[%s659_s0 + $0x38] sm:$0xff]  }
   0x7   :  { %502 = vmatpush3.bf16.msra.mxu0 %v548_v1  ;;  %540 = vmatpush3.bf16.msra.mxu1 %v548_v1 }
   0x8   :  { %503 = vmatprep.subr.bf16.mxu0 %v549_v2  ;;  %533 = vmatprep.subr.bf16.mxu1 %v549_v2 }
   0xb   :  { %504 = vmatpush3.bf16.msra.mxu0 %v549_v2  ;;  %541 = vmatpush3.bf16.msra.mxu1 %v549_v2 }
   0xc   :  { %505 = vmatprep.subr.bf16.mxu0 %v550_v3  ;;  %534 = vmatprep.subr.bf16.mxu1 %v550_v3 }
   0xf   :  { %506 = vmatpush3.bf16.msra.mxu0 %v550_v3  ;;  %542 = vmatpush3.bf16.msra.mxu1 %v550_v3 }
  0x10   :  { %507 = vmatprep.subr.bf16.mxu0 %v551_v5  ;;  %535 = vmatprep.subr.bf16.mxu1 %v551_v5 }
  0x13   :  { %508 = vmatpush3.bf16.msra.mxu0 %v551_v5  ;;  %543 = vmatpush3.bf16.msra.mxu1 %v551_v5 }
  0x14   :  { %509 = vmatprep.subr.bf16.mxu0 %v552_v7  ;;  %536 = vmatprep.subr.bf16.mxu1 %v552_v7 }
  0x17   :  { %510 = vmatpush3.bf16.msra.mxu0 %v552_v7  ;;  %544 = vmatpush3.bf16.msra.mxu1 %v552_v7 }
  0x18   :  { %511 = vmatprep.subr.bf16.mxu0 %v553_v8  ;;  %537 = vmatprep.subr.bf16.mxu1 %v553_v8 }
  0x1b   :  { %512 = vmatpush3.bf16.msra.mxu0 %v553_v8  ;;  %545 = vmatpush3.bf16.msra.mxu1 %v553_v8 }
  0x1c   :  { %513 = vmatprep.subr.bf16.mxu0 %v554_v9  ;;  %538 = vmatprep.subr.bf16.mxu1 %v554_v9 }
  0x1f   :  { %514 = vmatpush3.bf16.msra.mxu0 %v554_v9  ;;  %546 = vmatpush3.bf16.msra.mxu1 %v554_v9 }
  0x22   :  { %516 = vmatmul.mubr.bf16.vlgmr.msra.gmra.mrb[0].mxu0 %v556_v10  ;;  %524 = vmatmul.mubr.bf16.vlgmr.msra.gmra.mrb[0].mxu1 %v560_v11 }
  0x23   :  { %519 = vmatprep.mubr.bf16.mxu0 %v557_v12  ;;  %527 = vmatprep.mubr.bf16.mxu1 %v561_v13 }
  0x2a   :  { %520 = vmatmul.mubr.bf16.gmra.mrb[4].mxu0 %v558_v14  ;;  %528 = vmatmul.mubr.bf16.gmra.mrb[4].mxu1 %v562_v15 }
  0xf5   :  { %v517_v16 = vpop.f32.mrb[0].mxu0  ;;  %v525_v17 = vpop.f32.mrb[0].mxu1 }
  0xf6   :  { %v176_v18 = vpop.f32.mrb[1].mxu0  ;;  %v208_v19 = vpop.f32.mrb[1].mxu1  ;;  %v342_v31 = vmul.f32 %v517_v16, %v517_v16  ;;  %v350_v3 = vmul.f32 %v525_v17, %v525_v17 }
  0xf7   :  { %v518_v20 = vpop.f32.mrb[2].mxu0  ;;  %v526_v21 = vpop.f32.mrb[2].mxu1  ;;  %v340_v22 = vmul.f32 %v176_v18, %v176_v18  ;;  %v348_v61 = vmul.f32 %v208_v19, %v208_v19 }
  0xf8   :  { %v444_v23 = vpack.c.bf16 %v518_v20, %v517_v16  ;;  %v179_v24 = vpop.f32.mrb[3].mxu0  ;;  %v464_v25 = vpack.c.bf16 %v526_v21, %v525_v17  ;;  %v211_v26 = vpop.f32.mrb[3].mxu1  ;;  %v343_v34 = vmul.f32 %v518_v20, %v518_v20  ;;  %v351_v6 = vmul.f32 %v526_v21, %v526_v21 }
  0xf9   :  { %v439_v27 = vpack.c.bf16 %v179_v24, %v176_v18  ;;  %v319_v28 = vadd.f32 %v179_v24, %v176_v18  ;;  %v341_v29 = vmul.f32 %v179_v24, %v179_v24  ;;  %v459_v30 = vpack.c.bf16 %v211_v26, %v208_v19 }
  0xfa   :  { %476 = vst [vmem:[%s660_s2 + $0x8] sm:$0xff] %v444_v23   ;;  %480 = vst [vmem:[%s660_s2 + $0x28] sm:$0xff] %v464_v25   ;;  %v349_v2 = vmul.f32 %v211_v26, %v211_v26 }
  0xfb   :  { %440 = vst [vmem:[%s660_s2] sm:$0xff] %v439_v27   ;;  %v320_v32 = vadd.f32 %v517_v16, %v319_v28  ;;  %v356_v33 = vadd.f32 %v341_v29, %v340_v22  ;;  %479 = vst [vmem:[%s660_s2 + $0x20] sm:$0xff] %v459_v30  }
  0xfd   :  { %v357_v35 = vadd.f32 %v356_v33, %v342_v31  ;;  %v521_v36 = vpop.f32.mrb[4].mxu0  ;;  %v321_v37 = vadd.f32 %v518_v20, %v320_v32  ;;  %v529_v38 = vpop.f32.mrb[4].mxu1 }
  0xfe   :  { %v192_v39 = vpop.f32.mrb[5].mxu0  ;;  %v224_v40 = vpop.f32.mrb[5].mxu1  ;;  %v346_v55 = vmul.f32 %v521_v36, %v521_v36  ;;  %v354_v15 = vmul.f32 %v529_v38, %v529_v38 }
  0xff   :  { %v322_v41 = vadd.f32 %v321_v37, %v192_v39  ;;  %v344_v42 = vmul.f32 %v192_v39, %v192_v39  ;;  %v358_v43 = vadd.f32 %v357_v35, %v343_v34  ;;  %v522_v44 = vpop.f32.mrb[6].mxu0  ;;  %v530_v45 = vpop.f32.mrb[6].mxu1  ;;  %v352_v9 = vmul.f32 %v224_v40, %v224_v40 }
 0x100   :  { %v454_v46 = vpack.c.bf16 %v522_v44, %v521_v36  ;;  %v195_v47 = vpop.f32.mrb[7].mxu0  ;;  %v474_v48 = vpack.c.bf16 %v530_v45, %v529_v38  ;;  %v227_v49 = vpop.f32.mrb[7].mxu1  ;;  %v347_v58 = vmul.f32 %v522_v44, %v522_v44 }
 0x101   :  { %v359_v50 = vadd.f32 %v358_v43, %v344_v42  ;;  %v449_v51 = vpack.c.bf16 %v195_v47, %v192_v39  ;;  %v323_v52 = vadd.f32 %v322_v41, %v195_v47  ;;  %v345_v53 = vmul.f32 %v195_v47, %v195_v47 }
 0x102   :  { %478 = vst [vmem:[%s660_s2 + $0x18] sm:$0xff] %v454_v46   ;;  %482 = vst [vmem:[%s660_s2 + $0x38] sm:$0xff] %v474_v48   ;;  %v469_v54 = vpack.c.bf16 %v227_v49, %v224_v40  ;;  %v353_v14 = vmul.f32 %v227_v49, %v227_v49 }
 0x103   :  { %477 = vst [vmem:[%s660_s2 + $0x10] sm:$0xff] %v449_v51   ;;  %v324_v56 = vadd.f32 %v521_v36, %v323_v52  ;;  %v360_v57 = vadd.f32 %v359_v50, %v345_v53 }
 0x104   :  { %481 = vst [vmem:[%s660_s2 + $0x30] sm:$0xff] %v469_v54  }
 0x105   :  { %v361_v59 = vadd.f32 %v360_v57, %v346_v55  ;;  %v325_v60 = vadd.f32 %v522_v44, %v324_v56 }
 0x107   :  { %v326_v62 = vadd.f32 %v325_v60, %v208_v19  ;;  %v362_v63 = vadd.f32 %v361_v59, %v347_v58  ;;  %v355_v19 = vmul.f32 %v530_v45, %v530_v45 }
 0x109   :  { %v363_v0 = vadd.f32 %v362_v63, %v348_v61  ;;  %v327_v1 = vadd.f32 %v326_v62, %v211_v26 }
 0x10b   :  { %v328_v4 = vadd.f32 %v525_v17, %v327_v1  ;;  %v364_v5 = vadd.f32 %v363_v0, %v349_v2 }
 0x10d   :  { %v365_v7 = vadd.f32 %v364_v5, %v350_v3  ;;  %v329_v8 = vadd.f32 %v526_v21, %v328_v4 }
 0x10f   :  { %v330_v10 = vadd.f32 %v329_v8, %v224_v40  ;;  %v366_v11 = vadd.f32 %v365_v7, %v351_v6 }
 0x111   :  { %v367_v12 = vadd.f32 %v366_v11, %v352_v9  ;;  %v331_v13 = vadd.f32 %v330_v10, %v227_v49 }
 0x113   :  { %v332_v16 = vadd.f32 %v529_v38, %v331_v13  ;;  %v368_v18 = vadd.f32 %v367_v12, %v353_v14 }
 0x115   :  { %v333_v20 = vadd.f32 %v530_v45, %v332_v16  ;;  %v369_v22 = vadd.f32 %v368_v18, %v354_v15 }
 0x117   :  { %v334_v23 = vrot.slane %v333_v20, 4  ;;  %v370_v24 = vadd.f32 %v369_v22, %v355_v19 }
 0x119   :  { %v335_v25 = vadd.f32 %v334_v23, %v333_v20  ;;  %v371_v17 = vrot.slane %v370_v24, 4 }
 0x11b   :  { %v336_v26 = vrot.slane %v335_v25, 2  ;;  %v372_v27 = vadd.f32 %v371_v17, %v370_v24 }
 0x11d   :  { %v337_v28 = vadd.f32 %v336_v26, %v335_v25  ;;  %v373_v21 = vrot.slane %v372_v27, 2 }
 0x11f   :  { %v338_v29 = vrot.slane %v337_v28, 1  ;;  %v374_v30 = vadd.f32 %v373_v21, %v372_v27 }
 0x121   :  { %v375_v31 = vrot.slane %v374_v30, 1  ;;  %v339_v32 = vadd.f32 %v338_v29, %v337_v28 }
 0x123   :  { %v376_v33 = vadd.f32 %v375_v31, %v374_v30 }
 0x125   :  { %v378_v34 = vsel %vm377_vm0, %v339_v32, %v376_v33 }
 0x126   :  { %379 = vst [vmem:[%s661_s3] sm:$0x3] %v378_v34 }

// kernel: a_call__.11
= control target key start
LH: loop header
LB: loop body
LE: loop exit
PB: predicated region body
PF: predicated region fallthrough
CT: control target
= control target key end

     0   :  { %vm96_vm0 = vcmask 1043456   ;;  %vm71_vm1 = vcmask 64512   ;;  %vm335_vm2 = vcmask 1040384   ;;  %s562_s1 = inlined_call_operand.vmem [shape: bf16[8,128], index: 1, kind: input, shape index: {}]   ;;  %s563_s0 = inlined_call_operand.vmem [shape: bf16[128,8], index: 0, kind: input, shape index: {}]   ;;  %s564_s2 = inlined_call_operand.vmem [shape: bf16[128,128], index: 2, kind: output, shape index: {0}]   ;;  %s565_s3 = inlined_call_operand.vmem [shape: f32[1,2,128], index: 3, kind: output, shape index: {1}]  }
   0x1   :  { %v30_v0 = vld [vmem:[%s562_s1] sm:$0xf]  ;;  %v473_v3 = vld [vmem:[%s563_s0 + $0x8] sm:$0xff]   ;;  %v474_v4 = vld [vmem:[%s563_s0 + $0x10] sm:$0xff]  }
   0x2   :  { %470 = vmatprep.subr.msk.bf16.mxu0 %vm96_vm0, %v30_v0  ;;  %v98_v1 = vsel %vm96_vm0, %v30_v0, 0  ;;  %v472_v2 = vld [vmem:[%s563_s0] sm:$0xff]   ;;  %471 = vmatprep.subr.msk.bf16.mxu1 %vm96_vm0, %v30_v0  ;;  %v477_v6 = vld [vmem:[%s563_s0 + $0x28] sm:$0xff]   ;;  %v478_v7 = vld [vmem:[%s563_s0 + $0x30] sm:$0xff]  }
   0x3   :  { %451 = vmatpush3.bf16.msra.mxu0 %v98_v1  ;;  %469 = vmatpush3.bf16.msra.mxu1 %v98_v1  ;;  %v476_v5 = vld [vmem:[%s563_s0 + $0x20] sm:$0xff]   ;;  %v475_v8 = vld [vmem:[%s563_s0 + $0x18] sm:$0xff]  }
   0x4   :  { %452 = vmatprep.mubr.msk.bf16.mxu0 %vm71_vm1, %v472_v2  ;;  %460 = vmatprep.mubr.msk.bf16.mxu1 %vm71_vm1, %v476_v5  ;;  %v479_v9 = vld [vmem:[%s563_s0 + $0x38] sm:$0xff]  }
   0x6   :  { %453 = vmatmul.mubr.msk.bf16.vlgmr.msra.gmra.mrb[0].mxu0 %vm71_vm1, %v473_v3  ;;  %461 = vmatmul.mubr.msk.bf16.vlgmr.msra.gmra.mrb[0].mxu1 %vm71_vm1, %v477_v6 }
   0x7   :  { %456 = vmatprep.mubr.msk.bf16.mxu0 %vm71_vm1, %v474_v4  ;;  %464 = vmatprep.mubr.msk.bf16.mxu1 %vm71_vm1, %v478_v7 }
   0xe   :  { %457 = vmatmul.mubr.msk.bf16.gmra.mrb[4].mxu0 %vm71_vm1, %v475_v8  ;;  %465 = vmatmul.mubr.msk.bf16.gmra.mrb[4].mxu1 %vm71_vm1, %v479_v9 }
  0xd9   :  { %v454_v10 = vpop.f32.mrb[0].mxu0  ;;  %v462_v15 = vpop.f32.mrb[0].mxu1 }
  0xda   :  { %v134_v11 = vpop.f32.mrb[1].mxu0  ;;  %v166_v20 = vpop.f32.mrb[1].mxu1  ;;  %v300_v22 = vmul.f32 %v454_v10, %v454_v10  ;;  %v308_v61 = vmul.f32 %v462_v15, %v462_v15 }
  0xdb   :  { %v455_v12 = vpop.f32.mrb[2].mxu0  ;;  %v298_v16 = vmul.f32 %v134_v11, %v134_v11  ;;  %v463_v21 = vpop.f32.mrb[2].mxu1  ;;  %v306_v55 = vmul.f32 %v166_v20, %v166_v20 }
  0xdc   :  { %v402_v13 = vpack.c.bf16 %v455_v12, %v454_v10  ;;  %v137_v14 = vpop.f32.mrb[3].mxu0  ;;  %v422_v25 = vpack.c.bf16 %v463_v21, %v462_v15  ;;  %v169_v26 = vpop.f32.mrb[3].mxu1  ;;  %v301_v28 = vmul.f32 %v455_v12, %v455_v12  ;;  %v309_v0 = vmul.f32 %v463_v21, %v463_v21 }
  0xdd   :  { %v397_v17 = vpack.c.bf16 %v137_v14, %v134_v11  ;;  %v277_v18 = vadd.f32 %v137_v14, %v134_v11  ;;  %v299_v19 = vmul.f32 %v137_v14, %v137_v14  ;;  %v417_v27 = vpack.c.bf16 %v169_v26, %v166_v20 }
  0xde   :  { %434 = vst [vmem:[%s564_s2 + $0x8] sm:$0xff] %v402_v13   ;;  %438 = vst [vmem:[%s564_s2 + $0x28] sm:$0xff] %v422_v25   ;;  %v307_v60 = vmul.f32 %v169_v26, %v169_v26 }
  0xdf   :  { %398 = vst [vmem:[%s564_s2] sm:$0xff] %v397_v17   ;;  %v278_v23 = vadd.f32 %v454_v10, %v277_v18  ;;  %v314_v24 = vadd.f32 %v299_v19, %v298_v16  ;;  %437 = vst [vmem:[%s564_s2 + $0x20] sm:$0xff] %v417_v27  }
  0xe1   :  { %v315_v29 = vadd.f32 %v314_v24, %v300_v22  ;;  %v458_v30 = vpop.f32.mrb[4].mxu0  ;;  %v279_v31 = vadd.f32 %v455_v12, %v278_v23  ;;  %v466_v39 = vpop.f32.mrb[4].mxu1 }
  0xe2   :  { %v150_v32 = vpop.f32.mrb[5].mxu0  ;;  %v182_v44 = vpop.f32.mrb[5].mxu1  ;;  %v304_v46 = vmul.f32 %v458_v30, %v458_v30  ;;  %v312_v9 = vmul.f32 %v466_v39, %v466_v39 }
  0xe3   :  { %v280_v33 = vadd.f32 %v279_v31, %v150_v32  ;;  %v302_v34 = vmul.f32 %v150_v32, %v150_v32  ;;  %v316_v35 = vadd.f32 %v315_v29, %v301_v28  ;;  %v459_v36 = vpop.f32.mrb[6].mxu0  ;;  %v467_v45 = vpop.f32.mrb[6].mxu1  ;;  %v310_v3 = vmul.f32 %v182_v44, %v182_v44 }
  0xe4   :  { %v412_v37 = vpack.c.bf16 %v459_v36, %v458_v30  ;;  %v153_v38 = vpop.f32.mrb[7].mxu0  ;;  %v432_v49 = vpack.c.bf16 %v467_v45, %v466_v39  ;;  %v185_v50 = vpop.f32.mrb[7].mxu1  ;;  %v305_v52 = vmul.f32 %v459_v36, %v459_v36  ;;  %v313_v12 = vmul.f32 %v467_v45, %v467_v45 }
  0xe5   :  { %v317_v40 = vadd.f32 %v316_v35, %v302_v34  ;;  %v407_v41 = vpack.c.bf16 %v153_v38, %v150_v32  ;;  %v281_v42 = vadd.f32 %v280_v33, %v153_v38  ;;  %v303_v43 = vmul.f32 %v153_v38, %v153_v38 }
  0xe6   :  { %436 = vst [vmem:[%s564_s2 + $0x18] sm:$0xff] %v412_v37   ;;  %v427_v51 = vpack.c.bf16 %v185_v50, %v182_v44  ;;  %440 = vst [vmem:[%s564_s2 + $0x38] sm:$0xff] %v432_v49   ;;  %v311_v8 = vmul.f32 %v185_v50, %v185_v50 }
  0xe7   :  { %435 = vst [vmem:[%s564_s2 + $0x10] sm:$0xff] %v407_v41   ;;  %v282_v47 = vadd.f32 %v458_v30, %v281_v42  ;;  %v318_v48 = vadd.f32 %v317_v40, %v303_v43 }
  0xe8   :  { %439 = vst [vmem:[%s564_s2 + $0x30] sm:$0xff] %v427_v51  }
  0xe9   :  { %v319_v53 = vadd.f32 %v318_v48, %v304_v46  ;;  %v283_v54 = vadd.f32 %v459_v36, %v282_v47 }
  0xeb   :  { %v284_v56 = vadd.f32 %v283_v54, %v166_v20  ;;  %v320_v57 = vadd.f32 %v319_v53, %v305_v52 }
  0xed   :  { %v321_v58 = vadd.f32 %v320_v57, %v306_v55  ;;  %v285_v59 = vadd.f32 %v284_v56, %v169_v26 }
  0xef   :  { %v286_v62 = vadd.f32 %v462_v15, %v285_v59  ;;  %v322_v63 = vadd.f32 %v321_v58, %v307_v60 }
  0xf1   :  { %v323_v1 = vadd.f32 %v322_v63, %v308_v61  ;;  %v287_v2 = vadd.f32 %v463_v21, %v286_v62 }
  0xf3   :  { %v288_v4 = vadd.f32 %v287_v2, %v182_v44  ;;  %v324_v5 = vadd.f32 %v323_v1, %v309_v0 }
  0xf5   :  { %v325_v6 = vadd.f32 %v324_v5, %v310_v3  ;;  %v289_v7 = vadd.f32 %v288_v4, %v185_v50 }
  0xf7   :  { %v290_v10 = vadd.f32 %v466_v39, %v289_v7  ;;  %v326_v11 = vadd.f32 %v325_v6, %v311_v8 }
  0xf9   :  { %v291_v13 = vadd.f32 %v467_v45, %v290_v10  ;;  %v327_v14 = vadd.f32 %v326_v11, %v312_v9 }
  0xfb   :  { %v292_v16 = vrot.slane %v291_v13, 4  ;;  %v328_v17 = vadd.f32 %v327_v14, %v313_v12 }
  0xfd   :  { %v293_v18 = vadd.f32 %v292_v16, %v291_v13  ;;  %v329_v15 = vrot.slane %v328_v17, 4 }
  0xff   :  { %v294_v19 = vrot.slane %v293_v18, 2  ;;  %v330_v20 = vadd.f32 %v329_v15, %v328_v17 }
 0x101   :  { %v295_v22 = vadd.f32 %v294_v19, %v293_v18  ;;  %v331_v21 = vrot.slane %v330_v20, 2 }
 0x103   :  { %v296_v23 = vrot.slane %v295_v22, 1  ;;  %v332_v24 = vadd.f32 %v331_v21, %v330_v20 }
 0x105   :  { %v333_v25 = vrot.slane %v332_v24, 1  ;;  %v297_v26 = vadd.f32 %v296_v23, %v295_v22 }
 0x107   :  { %v334_v27 = vadd.f32 %v333_v25, %v332_v24 }
 0x109   :  { %v336_v28 = vsel %vm335_vm2, %v297_v26, %v334_v27 }
 0x10a   :  { %337 = vst [vmem:[%s565_s3] sm:$0x3] %v336_v28 }

// kernel: a_call__.13
= control target key start
LH: loop header
LB: loop body
LE: loop exit
PB: predicated region body
PF: predicated region fallthrough
CT: control target
= control target key end

     0   :  { %s647_s0 = inlined_call_operand.vmem [shape: bf16[128,128], index: 0, kind: input, shape index: {}]   ;;  %s648_s1 = inlined_call_operand.vmem [shape: f32[1,128], index: 1, kind: input, shape index: {}]   ;;  %s649_s2 = inlined_call_operand.vmem [shape: f32[1,128], index: 2, kind: input, shape index: {}]   ;;  %s650_s3 = inlined_call_operand.vmem [shape: bf16[128,128], index: 3, kind: input, shape index: {}]   ;;  %s651_s4 = inlined_call_operand.vmem [shape: f32[1,128], index: 4, kind: input, shape index: {}]   ;;  %s652_s5 = inlined_call_operand.vmem [shape: f32[1,128], index: 5, kind: input, shape index: {}]   ;;  %s653_s6 = inlined_call_operand.vmem [shape: bf16[128,128], index: 6, kind: output, shape index: {}]  }
   0x1   :  { %v332_v0 = vld [vmem:[%s647_s0] sm:$0xff]   ;;  %v435_v9 = vld [vmem:[%s647_s0 + $0x8] sm:$0xff]   ;;  %v436_v20 = vld [vmem:[%s647_s0 + $0x10] sm:$0xff]  }
   0x2   :  { %v497_v1 = vld [vmem:[%s648_s1] ss:$0 sm:$0xff]  ;;  %v333_v2 = vunpack.c.l.bf16 %v332_v0  ;;  %v334_v3 = vunpack.c.h.bf16 %v332_v0  ;;  %v442_v10 = vld [vmem:[%s650_s3 + $0x8] sm:$0xff]   ;;  %v337_v14 = vunpack.c.l.bf16 %v435_v9  ;;  %v338_v15 = vunpack.c.h.bf16 %v435_v9  ;;  %v443_v29 = vld [vmem:[%s650_s3 + $0x10] sm:$0xff]  }
   0x3   :  { %v364_v4 = vld [vmem:[%s650_s3] sm:$0xff]   ;;  %v369_v18 = vunpack.c.l.bf16 %v442_v10  ;;  %v370_v19 = vunpack.c.h.bf16 %v442_v10  ;;  %v341_v32 = vunpack.c.l.bf16 %v436_v20  ;;  %v342_v33 = vunpack.c.h.bf16 %v436_v20  ;;  %v437_v42 = vld [vmem:[%s647_s0 + $0x18] sm:$0xff]  }
   0x4   :  { %v505_v5 = vld [vmem:[%s651_s4] ss:$0 sm:$0xff]  ;;  %v365_v7 = vunpack.c.l.bf16 %v364_v4  ;;  %v366_v8 = vunpack.c.h.bf16 %v364_v4  ;;  %v62_v11 = vmul.f32 %v333_v2, %v497_v1  ;;  %v63_v12 = vmul.f32 %v334_v3, %v497_v1  ;;  %v444_v47 = vld [vmem:[%s650_s3 + $0x18] sm:$0xff]  }
   0x5   :  { %v510_v6 = vld [vmem:[%s649_s2] ss:$0 sm:$0xff]  ;;  %v64_v23 = vmul.f32 %v337_v14, %v497_v1  ;;  %v65_v24 = vmul.f32 %v338_v15, %v497_v1  ;;  %v142_v27 = vmul.f32 %v369_v18, %v505_v5  ;;  %v143_v28 = vmul.f32 %v370_v19, %v505_v5  ;;  %v439_v14 = vld [vmem:[%s647_s0 + $0x28] sm:$0xff]  }
   0x6   :  { %v523_v13 = vld [vmem:[%s652_s5] ss:$0 sm:$0xff]  ;;  %v140_v16 = vmul.f32 %v365_v7, %v505_v5  ;;  %v141_v17 = vmul.f32 %v366_v8, %v505_v5  ;;  %v85_v21 = vadd.f32 %v510_v6, %v62_v11  ;;  %v86_v22 = vadd.f32 %v510_v6, %v63_v12 }
   0x7   :  { %v87_v30 = vadd.f32 %v510_v6, %v64_v23  ;;  %v88_v31 = vadd.f32 %v510_v6, %v65_v24  ;;  %v165_v36 = vadd.f32 %v523_v13, %v142_v27  ;;  %v166_v37 = vadd.f32 %v523_v13, %v143_v28  ;;  %v438_v52 = vld [vmem:[%s647_s0 + $0x20] sm:$0xff]   ;;  %v446_v23 = vld [vmem:[%s650_s3 + $0x28] sm:$0xff]  }
   0x8   :  { %v163_v25 = vadd.f32 %v523_v13, %v140_v16  ;;  %v164_v26 = vadd.f32 %v523_v13, %v141_v17  ;;  %v66_v38 = vmul.f32 %v341_v32, %v497_v1  ;;  %v67_v39 = vmul.f32 %v342_v33, %v497_v1  ;;  %v445_v8 = vld [vmem:[%s650_s3 + $0x20] sm:$0xff]   ;;  %v440_v32 = vld [vmem:[%s647_s0 + $0x30] sm:$0xff]  }
   0x9   :  { %v373_v40 = vunpack.c.l.bf16 %v443_v29  ;;  %v374_v41 = vunpack.c.h.bf16 %v443_v29  ;;  %v181_v45 = vadd.f32 %v165_v36, %v87_v30  ;;  %v182_v46 = vadd.f32 %v166_v37, %v88_v31 }
   0xa   :  { %v179_v34 = vadd.f32 %v163_v25, %v85_v21  ;;  %v180_v35 = vadd.f32 %v164_v26, %v86_v22  ;;  %v89_v48 = vadd.f32 %v510_v6, %v66_v38  ;;  %v90_v49 = vadd.f32 %v510_v6, %v67_v39 }
   0xb   :  { %v144_v50 = vmul.f32 %v373_v40, %v505_v5  ;;  %v145_v51 = vmul.f32 %v374_v41, %v505_v5  ;;  %v197_v54 = vmax.f32 %v181_v45, 0.0  ;;  %v198_v55 = vmax.f32 %v182_v46, 0.0  ;;  %v447_v45 = vld [vmem:[%s650_s3 + $0x30] sm:$0xff]  }
   0xc   :  { %v195_v43 = vmax.f32 %v179_v34, 0.0  ;;  %v196_v44 = vmax.f32 %v180_v35, 0.0  ;;  %v345_v56 = vunpack.c.l.bf16 %v437_v42  ;;  %v346_v59 = vunpack.c.h.bf16 %v437_v42 }
   0xd   :  { %v167_v57 = vadd.f32 %v523_v13, %v144_v50  ;;  %v168_v58 = vadd.f32 %v523_v13, %v145_v51  ;;  %v377_v60 = vunpack.c.l.bf16 %v444_v47  ;;  %v403_v61 = vpack.c.bf16 %v198_v55, %v197_v54  ;;  %v441_v54 = vld [vmem:[%s647_s0 + $0x38] sm:$0xff]  }
   0xe   :  { %v398_v53 = vpack.c.bf16 %v196_v44, %v195_v43  ;;  %v68_v62 = vmul.f32 %v345_v56, %v497_v1  ;;  %v378_v63 = vunpack.c.h.bf16 %v444_v47  ;;  %v349_v0 = vunpack.c.l.bf16 %v438_v52 }
   0xf   :  { %v183_v2 = vadd.f32 %v167_v57, %v89_v48  ;;  %v184_v3 = vadd.f32 %v168_v58, %v90_v49  ;;  %v69_v4 = vmul.f32 %v346_v59, %v497_v1  ;;  %v146_v7 = vmul.f32 %v377_v60, %v505_v5  ;;  %449 = vst [vmem:[%s653_s6 + $0x8] sm:$0xff] %v403_v61  }
  0x10   :  { %399 = vst [vmem:[%s653_s6] sm:$0xff] %v398_v53   ;;  %v91_v9 = vadd.f32 %v510_v6, %v68_v62  ;;  %v147_v10 = vmul.f32 %v378_v63, %v505_v5  ;;  %v350_v11 = vunpack.c.h.bf16 %v438_v52  ;;  %v70_v12 = vmul.f32 %v349_v0, %v497_v1 }
  0x11   :  { %v199_v15 = vmax.f32 %v183_v2, 0.0  ;;  %v200_v16 = vmax.f32 %v184_v3, 0.0  ;;  %v92_v17 = vadd.f32 %v510_v6, %v69_v4  ;;  %v169_v18 = vadd.f32 %v523_v13, %v146_v7  ;;  %v448_v4 = vld [vmem:[%s650_s3 + $0x38] sm:$0xff]  }
  0x12   :  { %v170_v19 = vadd.f32 %v523_v13, %v147_v10  ;;  %v71_v20 = vmul.f32 %v350_v11, %v497_v1  ;;  %v93_v21 = vadd.f32 %v510_v6, %v70_v12  ;;  %v381_v22 = vunpack.c.l.bf16 %v445_v8 }
  0x13   :  { %v408_v24 = vpack.c.bf16 %v200_v16, %v199_v15  ;;  %v185_v25 = vadd.f32 %v169_v18, %v91_v9  ;;  %v382_v26 = vunpack.c.h.bf16 %v445_v8  ;;  %v353_v27 = vunpack.c.l.bf16 %v439_v14 }
  0x14   :  { %v186_v28 = vadd.f32 %v170_v19, %v92_v17  ;;  %v94_v29 = vadd.f32 %v510_v6, %v71_v20  ;;  %v148_v30 = vmul.f32 %v381_v22, %v505_v5  ;;  %v354_v31 = vunpack.c.h.bf16 %v439_v14 }
  0x15   :  { %450 = vst [vmem:[%s653_s6 + $0x10] sm:$0xff] %v408_v24   ;;  %v201_v33 = vmax.f32 %v185_v25, 0.0  ;;  %v149_v34 = vmul.f32 %v382_v26, %v505_v5  ;;  %v72_v35 = vmul.f32 %v353_v27, %v497_v1  ;;  %v385_v36 = vunpack.c.l.bf16 %v446_v23 }
  0x16   :  { %v202_v37 = vmax.f32 %v186_v28, 0.0  ;;  %v171_v38 = vadd.f32 %v523_v13, %v148_v30  ;;  %v73_v39 = vmul.f32 %v354_v31, %v497_v1  ;;  %v386_v40 = vunpack.c.h.bf16 %v446_v23 }
  0x17   :  { %v172_v41 = vadd.f32 %v523_v13, %v149_v34  ;;  %v95_v42 = vadd.f32 %v510_v6, %v72_v35  ;;  %v150_v43 = vmul.f32 %v385_v36, %v505_v5  ;;  %v357_v44 = vunpack.c.l.bf16 %v440_v32 }
  0x18   :  { %v413_v46 = vpack.c.bf16 %v202_v37, %v201_v33  ;;  %v187_v47 = vadd.f32 %v171_v38, %v93_v21  ;;  %v96_v48 = vadd.f32 %v510_v6, %v73_v39  ;;  %v151_v49 = vmul.f32 %v386_v40, %v505_v5 }
  0x19   :  { %v188_v50 = vadd.f32 %v172_v41, %v94_v29  ;;  %v173_v51 = vadd.f32 %v523_v13, %v150_v43  ;;  %v358_v52 = vunpack.c.h.bf16 %v440_v32  ;;  %v74_v53 = vmul.f32 %v357_v44, %v497_v1 }
  0x1a   :  { %451 = vst [vmem:[%s653_s6 + $0x18] sm:$0xff] %v413_v46   ;;  %v203_v55 = vmax.f32 %v187_v47, 0.0  ;;  %v174_v56 = vadd.f32 %v523_v13, %v151_v49  ;;  %v389_v57 = vunpack.c.l.bf16 %v447_v45  ;;  %v390_v58 = vunpack.c.h.bf16 %v447_v45 }
  0x1b   :  { %v204_v59 = vmax.f32 %v188_v50, 0.0  ;;  %v189_v60 = vadd.f32 %v173_v51, %v95_v42  ;;  %v75_v61 = vmul.f32 %v358_v52, %v497_v1  ;;  %v97_v62 = vadd.f32 %v510_v6, %v74_v53 }
  0x1c   :  { %v190_v63 = vadd.f32 %v174_v56, %v96_v48  ;;  %v152_v0 = vmul.f32 %v389_v57, %v505_v5  ;;  %v153_v2 = vmul.f32 %v390_v58, %v505_v5  ;;  %v361_v3 = vunpack.c.l.bf16 %v441_v54 }
  0x1d   :  { %v418_v7 = vpack.c.bf16 %v204_v59, %v203_v55  ;;  %v205_v8 = vmax.f32 %v189_v60, 0.0  ;;  %v98_v9 = vadd.f32 %v510_v6, %v75_v61  ;;  %v362_v10 = vunpack.c.h.bf16 %v441_v54 }
  0x1e   :  { %v206_v11 = vmax.f32 %v190_v63, 0.0  ;;  %v175_v12 = vadd.f32 %v523_v13, %v152_v0  ;;  %v176_v14 = vadd.f32 %v523_v13, %v153_v2  ;;  %v76_v15 = vmul.f32 %v361_v3, %v497_v1 }
  0x1f   :  { %452 = vst [vmem:[%s653_s6 + $0x20] sm:$0xff] %v418_v7   ;;  %v77_v16 = vmul.f32 %v362_v10, %v497_v1  ;;  %v393_v17 = vunpack.c.l.bf16 %v448_v4  ;;  %v394_v18 = vunpack.c.h.bf16 %v448_v4 }
  0x20   :  { %v423_v19 = vpack.c.bf16 %v206_v11, %v205_v8  ;;  %v191_v20 = vadd.f32 %v175_v12, %v97_v62  ;;  %v192_v21 = vadd.f32 %v176_v14, %v98_v9  ;;  %v99_v22 = vadd.f32 %v510_v6, %v76_v15 }
  0x21   :  { %v100_v23 = vadd.f32 %v510_v6, %v77_v16  ;;  %v154_v24 = vmul.f32 %v393_v17, %v505_v5  ;;  %v155_v25 = vmul.f32 %v394_v18, %v505_v5 }
  0x22   :  { %453 = vst [vmem:[%s653_s6 + $0x28] sm:$0xff] %v423_v19   ;;  %v207_v26 = vmax.f32 %v191_v20, 0.0  ;;  %v208_v27 = vmax.f32 %v192_v21, 0.0 }
  0x23   :  { %v177_v1 = vadd.f32 %v523_v13, %v154_v24  ;;  %v178_v28 = vadd.f32 %v523_v13, %v155_v25 }
  0x24   :  { %v428_v29 = vpack.c.bf16 %v208_v27, %v207_v26 }
  0x25   :  { %v193_v30 = vadd.f32 %v177_v1, %v99_v22  ;;  %v194_v31 = vadd.f32 %v178_v28, %v100_v23 }
  0x26   :  { %454 = vst [vmem:[%s653_s6 + $0x30] sm:$0xff] %v428_v29  }
  0x27   :  { %v209_v6 = vmax.f32 %v193_v30, 0.0  ;;  %v210_v32 = vmax.f32 %v194_v31, 0.0 }
  0x29   :  { %v433_v5 = vpack.c.bf16 %v210_v32, %v209_v6 }
  0x2b   :  { %455 = vst [vmem:[%s653_s6 + $0x38] sm:$0xff] %v433_v5  }

</bundles_post_ra>
